<compile_context>
chip_gen: v5e
topology: v5e:2x2
jax: 0.10.0
libtpu: 0.0.40
codegen_flags: <defaults>
</compile_context>

<pallas_src>
import jax
import jax.numpy as jnp
from jax.experimental import pallas as pl
from jax.experimental.pallas import tpu as pltpu

LN_EPS = 1e-5  # torch.nn.LayerNorm default


def _round_up(n, m):
    return ((n + m - 1) // m) * m


def _transition_kernel(feat_ref, act_ref, w1f_ref, w1a_ref, b1_ref,
                       gamma_ref, beta_ref, w2_ref, b2_ref, mu_ref):
    # Linear 1 with fused concat:
    #   h = feat @ w1_feat + act @ w1_act + b1        (f32 accumulation)
    h = (jnp.dot(feat_ref[...], w1f_ref[...], preferred_element_type=jnp.float32)
         + jnp.dot(act_ref[...], w1a_ref[...], preferred_element_type=jnp.float32)
         + b1_ref[...])

    # LayerNorm over the last axis, single-pass statistics.
    width = h.shape[-1]
    inv_w = 1.0 / width
    s1 = jnp.sum(h, axis=-1, keepdims=True)
    s2 = jnp.sum(h * h, axis=-1, keepdims=True)
    mean = s1 * inv_w
    var = jnp.maximum(s2 * inv_w - mean * mean, 0.0)
    h = (h - mean) * jax.lax.rsqrt(var + LN_EPS)
    h = h * gamma_ref[...] + beta_ref[...]

    # ReLU
    h = jnp.maximum(h, 0.0)

    # Linear 2 (fc_mu). Cast h to the (possibly bf16) weight dtype for the MXU,
    # accumulate in f32.
    mu = (jnp.dot(h.astype(w2_ref.dtype), w2_ref[...],
                  preferred_element_type=jnp.float32)
          + b2_ref[...])
    mu_ref[...] = mu.astype(mu_ref.dtype)


def deterministic_transition_forward(features, action, params, *,
                                     tile_batch=512, use_bf16=False):
    """Returns (mu, sigma) with sigma = None, matching the PyTorch module.

    `features` is [B, encoder_feature_dim], `action` is [B, action_dim]
    (the module is always called with x = concat([features, action], -1));
    the concat is fused into the kernel.
    """
    B, F = features.shape
    B2, A = action.shape
    if B != B2:
        raise ValueError("features / action batch mismatch")
    W = params["w1_feat"].shape[1]

    w1f, w1a, w2 = params["w1_feat"], params["w1_act"], params["w2"]
    b1, gamma, beta, b2 = (params["b1"], params["gamma"],
                           params["beta"], params["b2"])

    if use_bf16:
        # Halve DMA bytes / double MXU rate on v6e+v7x. LayerNorm, biases and
        # accumulation stay in f32.
        features = features.astype(jnp.bfloat16)
        action = action.astype(jnp.bfloat16)
        w1f = w1f.astype(jnp.bfloat16)
        w1a = w1a.astype(jnp.bfloat16)
        w2 = w2.astype(jnp.bfloat16)

    # Batch tiling: TB rows per grid step (multiple of 8 sublanes); pad the
    # batch up to a multiple of TB and slice the padding back off afterwards.
    TB = min(_round_up(tile_batch, 8), _round_up(B, 8))
    Bp = _round_up(B, TB)
    if Bp != B:
        features = jnp.pad(features, ((0, Bp - B), (0, 0)))
        action = jnp.pad(action, ((0, Bp - B), (0, 0)))
    num_tiles = Bp // TB

    flops = 2 * Bp * ((F + A) * W + W * F)
    bytes_accessed = (features.nbytes + action.nbytes + w1f.nbytes
                      + w1a.nbytes + w2.nbytes + b1.nbytes + gamma.nbytes
                      + beta.nbytes + b2.nbytes + Bp * F * 4)

    mu = pl.pallas_call(
        _transition_kernel,
        out_shape=jax.ShapeDtypeStruct((Bp, F), jnp.float32),
        grid=(num_tiles,),
        in_specs=[
            pl.BlockSpec((TB, F), lambda i: (i, 0)),   # features (batch-tiled)
            pl.BlockSpec((TB, A), lambda i: (i, 0)),   # action   (batch-tiled)
            pl.BlockSpec((F, W), lambda i: (0, 0)),    # w1_feat  (VMEM-resident)
            pl.BlockSpec((A, W), lambda i: (0, 0)),    # w1_act
            pl.BlockSpec((1, W), lambda i: (0, 0)),    # b1
            pl.BlockSpec((1, W), lambda i: (0, 0)),    # ln gamma
            pl.BlockSpec((1, W), lambda i: (0, 0)),    # ln beta
            pl.BlockSpec((W, F), lambda i: (0, 0)),    # w2
            pl.BlockSpec((1, F), lambda i: (0, 0)),    # b2
        ],
        out_specs=pl.BlockSpec((TB, F), lambda i: (i, 0)),
        compiler_params=pltpu.CompilerParams(
            dimension_semantics=("parallel",)),
        cost_estimate=pl.CostEstimate(
            flops=int(flops),
            transcendentals=int(Bp),            # one rsqrt per row
            bytes_accessed=int(bytes_accessed)),
    )(features, action, w1f, w1a, b1, gamma, beta, w2, b2)

    if Bp != B:
        mu = mu[:B]
    return mu, None


def deterministic_transition_forward_concat(x, params, **kw):
    """Drop-in for the PyTorch forward(x) with x = [B, feat_dim + action_dim]."""
    F = params["w1_feat"].shape[0]
    return deterministic_transition_forward(x[:, :F], x[:, F:], params, **kw)


def init_params(key, encoder_feature_dim, action_dim, layer_width,
                dtype=jnp.float32):
    """PyTorch-style uniform fan-in init; fc weight pre-split into feat/act parts."""
    d_in = encoder_feature_dim + action_dim
    k1, k2, k3, k4, k5 = jax.random.split(key, 5)
    bound1 = 1.0 / jnp.sqrt(d_in)
    bound2 = 1.0 / jnp.sqrt(layer_width)
    return {
        # stored as [in, out] (transposed vs torch's [out, in]); fc weight split
        # into the rows that multiply encoder features vs action.
        "w1_feat": jax.random.uniform(k1, (encoder_feature_dim, layer_width),
                                      dtype, minval=-bound1, maxval=bound1),
        "w1_act": jax.random.uniform(k2, (action_dim, layer_width),
                                     dtype, minval=-bound1, maxval=bound1),
        "b1": jax.random.uniform(k3, (1, layer_width), dtype,
                                 minval=-bound1, maxval=bound1),
        "gamma": jnp.ones((1, layer_width), dtype),
        "beta": jnp.zeros((1, layer_width), dtype),
        "w2": jax.random.uniform(k4, (layer_width, encoder_feature_dim), dtype,
                                 minval=-bound2, maxval=bound2),
        "b2": jax.random.uniform(k5, (1, encoder_feature_dim), dtype,
                                 minval=-bound2, maxval=bound2),
    }


def _reference_forward(features, action, params):
    x = jnp.concatenate([features, action], axis=-1)
    w1 = jnp.concatenate([params["w1_feat"], params["w1_act"]], axis=0)
    h = jnp.dot(x, w1, precision=jax.lax.Precision.HIGHEST) + params["b1"]
    mean = jnp.mean(h, axis=-1, keepdims=True)
    var = jnp.mean((h - mean) ** 2, axis=-1, keepdims=True)
    h = (h - mean) / jnp.sqrt(var + LN_EPS)
    h = h * params["gamma"] + params["beta"]
    h = jnp.maximum(h, 0.0)
    return jnp.dot(h, params["w2"],
                   precision=jax.lax.Precision.HIGHEST) + params["b2"]


if __name__ == "__main__":
    encoder_feature_dim = 32
    action_dim = 4            # action_shape = (4,)
    layer_width = 64

    key = jax.random.PRNGKey(0)
    kp, kf, ka, kf2, ka2 = jax.random.split(key, 5)
    params = init_params(kp, encoder_feature_dim, action_dim, layer_width)

    # --- small case (module-scale shapes, strict f32 check) ------------------
    B_small = 8
    feat = jax.random.normal(kf, (B_small, encoder_feature_dim), jnp.float32)
    act = jax.random.normal(ka, (B_small, action_dim), jnp.float32)

    mu, sigma = deterministic_transition_forward(feat, act, params)
    mu = jax.block_until_ready(mu)
    assert sigma is None
    assert mu.shape == (B_small, encoder_feature_dim)
    ref = _reference_forward(feat, act, params)
    assert jnp.allclose(mu, ref, atol=1e-4, rtol=1e-4), "f32 mismatch (small)"

    # --- larger batch: exercises multi-tile grid, megacore-parallel batch axis
    # and the ragged-batch padding path ---------------------------------------
    B_big = 1000
    feat_b = jax.random.normal(kf2, (B_big, encoder_feature_dim), jnp.float32)
    act_b = jax.random.normal(ka2, (B_big, action_dim), jnp.float32)

    mu_b, _ = deterministic_transition_forward(feat_b, act_b, params,
                                               tile_batch=256)
    mu_b = jax.block_until_ready(mu_b)
    ref_b = _reference_forward(feat_b, act_b, params)
    assert mu_b.shape == (B_big, encoder_feature_dim)
    assert jnp.allclose(mu_b, ref_b, atol=1e-4, rtol=1e-4), "f32 mismatch (big)"

    # --- bf16 matmul-input path (f32 accumulation / LayerNorm) ---------------
    mu_bf, _ = deterministic_transition_forward(feat_b, act_b, params,
                                                tile_batch=256, use_bf16=True)
    mu_bf = jax.block_until_ready(mu_bf)
    assert jnp.allclose(mu_bf, ref_b, atol=1e-1, rtol=1e-1), "bf16 sanity fail"

    print("KERNEL_OK")
</pallas_src>

<mosaic_0001>
module attributes {stable_mosaic.version = 11 : i64} {
  func.func @_transition_kernel(%arg0: i32, %arg1: memref<8x32xf32, #tpu.memory_space<vmem>>, %arg2: memref<8x4xf32, #tpu.memory_space<vmem>>, %arg3: memref<32x64xf32, #tpu.memory_space<vmem>>, %arg4: memref<4x64xf32, #tpu.memory_space<vmem>>, %arg5: memref<1x64xf32, #tpu.memory_space<vmem>>, %arg6: memref<1x64xf32, #tpu.memory_space<vmem>>, %arg7: memref<1x64xf32, #tpu.memory_space<vmem>>, %arg8: memref<64x32xf32, #tpu.memory_space<vmem>>, %arg9: memref<1x32xf32, #tpu.memory_space<vmem>>, %arg10: memref<8x32xf32, #tpu.memory_space<vmem>>) attributes {dimension_semantics = [#tpu.dimension_semantics<parallel>], iteration_bounds = array<i64: 1>, scalar_prefetch = 0 : i64, scratch_operands = 0 : i64, tpu.core_type = #tpu.core_type<tc>, window_params = [{transform_indices = @transform_0, window_bounds = array<i64: 8, 32>}, {transform_indices = @transform_1, window_bounds = array<i64: 8, 4>}, {pipeline_mode = #tpu.pipeline_mode<synchronous>, transform_indices = @transform_2, window_bounds = array<i64: 32, 64>}, {pipeline_mode = #tpu.pipeline_mode<synchronous>, transform_indices = @transform_3, window_bounds = array<i64: 4, 64>}, {pipeline_mode = #tpu.pipeline_mode<synchronous>, transform_indices = @transform_4, window_bounds = array<i64: 1, 64>}, {pipeline_mode = #tpu.pipeline_mode<synchronous>, transform_indices = @transform_5, window_bounds = array<i64: 1, 64>}, {pipeline_mode = #tpu.pipeline_mode<synchronous>, transform_indices = @transform_6, window_bounds = array<i64: 1, 64>}, {pipeline_mode = #tpu.pipeline_mode<synchronous>, transform_indices = @transform_7, window_bounds = array<i64: 64, 32>}, {pipeline_mode = #tpu.pipeline_mode<synchronous>, transform_indices = @transform_8, window_bounds = array<i64: 1, 32>}, {transform_indices = @transform_9, window_bounds = array<i64: 8, 32>}]} {
    %c0 = arith.constant 0 : index
    %c0_0 = arith.constant 0 : index
    %0 = vector.load %arg1[%c0, %c0_0] : memref<8x32xf32, #tpu.memory_space<vmem>>, vector<8x32xf32>
    %c0_1 = arith.constant 0 : index
    %c0_2 = arith.constant 0 : index
    %1 = vector.load %arg3[%c0_1, %c0_2] : memref<32x64xf32, #tpu.memory_space<vmem>>, vector<32x64xf32>
    %cst = arith.constant dense<0.000000e+00> : vector<8x64xf32>
    %2 = tpu.matmul %0, %1, %cst {dimension_numbers = #tpu.dot_dimension_numbers<[1], [0], [0], [1], [0, 0, 1, 1], [], []>} : vector<8x32xf32>, vector<32x64xf32>, vector<8x64xf32> -> vector<8x64xf32>
    %c0_3 = arith.constant 0 : index
    %c0_4 = arith.constant 0 : index
    %3 = vector.load %arg2[%c0_3, %c0_4] : memref<8x4xf32, #tpu.memory_space<vmem>>, vector<8x4xf32>
    %c0_5 = arith.constant 0 : index
    %c0_6 = arith.constant 0 : index
    %4 = vector.load %arg4[%c0_5, %c0_6] : memref<4x64xf32, #tpu.memory_space<vmem>>, vector<4x64xf32>
    %cst_7 = arith.constant dense<0.000000e+00> : vector<8x64xf32>
    %5 = tpu.matmul %3, %4, %cst_7 {dimension_numbers = #tpu.dot_dimension_numbers<[1], [0], [0], [1], [0, 0, 1, 1], [], []>} : vector<8x4xf32>, vector<4x64xf32>, vector<8x64xf32> -> vector<8x64xf32>
    %6 = arith.addf %2, %5 : vector<8x64xf32>
    %c0_8 = arith.constant 0 : index
    %c0_9 = arith.constant 0 : index
    %7 = vector.load %arg5[%c0_8, %c0_9] : memref<1x64xf32, #tpu.memory_space<vmem>>, vector<1x64xf32>
    %8 = vector.broadcast %7 : vector<1x64xf32> to vector<8x64xf32>
    %9 = arith.addf %6, %8 : vector<8x64xf32>
    %cst_10 = arith.constant dense<0.000000e+00> : vector<8xf32>
    %10 = vector.multi_reduction <add>, %9, %cst_10 [1] : vector<8x64xf32> to vector<8xf32>
    %11 = vector.shape_cast %10 : vector<8xf32> to vector<8x1xf32>
    %12 = arith.mulf %9, %9 : vector<8x64xf32>
    %cst_11 = arith.constant dense<0.000000e+00> : vector<8xf32>
    %13 = vector.multi_reduction <add>, %12, %cst_11 [1] : vector<8x64xf32> to vector<8xf32>
    %14 = vector.shape_cast %13 : vector<8xf32> to vector<8x1xf32>
    %cst_12 = arith.constant 1.562500e-02 : f32
    %15 = vector.broadcast %cst_12 : f32 to vector<8x1xf32>
    %16 = arith.mulf %11, %15 : vector<8x1xf32>
    %cst_13 = arith.constant 1.562500e-02 : f32
    %17 = vector.broadcast %cst_13 : f32 to vector<8x1xf32>
    %18 = arith.mulf %14, %17 : vector<8x1xf32>
    %19 = arith.mulf %16, %16 : vector<8x1xf32>
    %20 = arith.subf %18, %19 : vector<8x1xf32>
    %cst_14 = arith.constant 0.000000e+00 : f32
    %21 = vector.broadcast %cst_14 : f32 to vector<8x1xf32>
    %22 = arith.maximumf %20, %21 : vector<8x1xf32>
    %23 = vector.broadcast %16 : vector<8x1xf32> to vector<8x64xf32>
    %24 = arith.subf %9, %23 : vector<8x64xf32>
    %cst_15 = arith.constant 9.99999974E-6 : f32
    %25 = vector.broadcast %cst_15 : f32 to vector<8x1xf32>
    %26 = arith.addf %22, %25 : vector<8x1xf32>
    %27 = math.rsqrt %26 : vector<8x1xf32>
    %28 = vector.broadcast %27 : vector<8x1xf32> to vector<8x64xf32>
    %29 = arith.mulf %24, %28 : vector<8x64xf32>
    %c0_16 = arith.constant 0 : index
    %c0_17 = arith.constant 0 : index
    %30 = vector.load %arg6[%c0_16, %c0_17] : memref<1x64xf32, #tpu.memory_space<vmem>>, vector<1x64xf32>
    %31 = vector.broadcast %30 : vector<1x64xf32> to vector<8x64xf32>
    %32 = arith.mulf %29, %31 : vector<8x64xf32>
    %c0_18 = arith.constant 0 : index
    %c0_19 = arith.constant 0 : index
    %33 = vector.load %arg7[%c0_18, %c0_19] : memref<1x64xf32, #tpu.memory_space<vmem>>, vector<1x64xf32>
    %34 = vector.broadcast %33 : vector<1x64xf32> to vector<8x64xf32>
    %35 = arith.addf %32, %34 : vector<8x64xf32>
    %cst_20 = arith.constant 0.000000e+00 : f32
    %36 = vector.broadcast %cst_20 : f32 to vector<8x64xf32>
    %37 = arith.maximumf %35, %36 : vector<8x64xf32>
    %c0_21 = arith.constant 0 : index
    %c0_22 = arith.constant 0 : index
    %38 = vector.load %arg8[%c0_21, %c0_22] : memref<64x32xf32, #tpu.memory_space<vmem>>, vector<64x32xf32>
    %cst_23 = arith.constant dense<0.000000e+00> : vector<8x32xf32>
    %39 = tpu.matmul %37, %38, %cst_23 {dimension_numbers = #tpu.dot_dimension_numbers<[1], [0], [0], [1], [0, 0, 1, 1], [], []>} : vector<8x64xf32>, vector<64x32xf32>, vector<8x32xf32> -> vector<8x32xf32>
    %c0_24 = arith.constant 0 : index
    %c0_25 = arith.constant 0 : index
    %40 = vector.load %arg9[%c0_24, %c0_25] : memref<1x32xf32, #tpu.memory_space<vmem>>, vector<1x32xf32>
    %41 = vector.broadcast %40 : vector<1x32xf32> to vector<8x32xf32>
    %42 = arith.addf %39, %41 : vector<8x32xf32>
    %c0_26 = arith.constant 0 : index
    %c0_27 = arith.constant 0 : index
    %43 = vector.load %arg10[%c0_26, %c0_27] : memref<8x32xf32, #tpu.memory_space<vmem>>, vector<8x32xf32>
    tpu.vector_store %arg10[%c0_26, %c0_27], %42 {strides = array<i32>} : memref<8x32xf32, #tpu.memory_space<vmem>>, vector<8x32xf32>,
    return
  }
  func.func @transform_0(%arg0: i32) -> (i32, i32) {
    %c0_i32 = arith.constant 0 : i32
    %c0_i32_0 = arith.constant 0 : i32
    return %arg0, %c0_i32 : i32, i32
  }
  func.func @transform_1(%arg0: i32) -> (i32, i32) {
    %c0_i32 = arith.constant 0 : i32
    %c0_i32_0 = arith.constant 0 : i32
    return %arg0, %c0_i32 : i32, i32
  }
  func.func @transform_2(%arg0: i32) -> (i32, i32) {
    %c0_i32 = arith.constant 0 : i32
    %c0_i32_0 = arith.constant 0 : i32
    %c0_i32_1 = arith.constant 0 : i32
    return %c0_i32, %c0_i32_0 : i32, i32
  }
  func.func @transform_3(%arg0: i32) -> (i32, i32) {
    %c0_i32 = arith.constant 0 : i32
    %c0_i32_0 = arith.constant 0 : i32
    %c0_i32_1 = arith.constant 0 : i32
    return %c0_i32, %c0_i32_0 : i32, i32
  }
  func.func @transform_4(%arg0: i32) -> (i32, i32) {
    %c0_i32 = arith.constant 0 : i32
    %c0_i32_0 = arith.constant 0 : i32
    %c0_i32_1 = arith.constant 0 : i32
    return %c0_i32, %c0_i32_0 : i32, i32
  }
  func.func @transform_5(%arg0: i32) -> (i32, i32) {
    %c0_i32 = arith.constant 0 : i32
    %c0_i32_0 = arith.constant 0 : i32
    %c0_i32_1 = arith.constant 0 : i32
    return %c0_i32, %c0_i32_0 : i32, i32
  }
  func.func @transform_6(%arg0: i32) -> (i32, i32) {
    %c0_i32 = arith.constant 0 : i32
    %c0_i32_0 = arith.constant 0 : i32
    %c0_i32_1 = arith.constant 0 : i32
    return %c0_i32, %c0_i32_0 : i32, i32
  }
  func.func @transform_7(%arg0: i32) -> (i32, i32) {
    %c0_i32 = arith.constant 0 : i32
    %c0_i32_0 = arith.constant 0 : i32
    %c0_i32_1 = arith.constant 0 : i32
    return %c0_i32, %c0_i32_0 : i32, i32
  }
  func.func @transform_8(%arg0: i32) -> (i32, i32) {
    %c0_i32 = arith.constant 0 : i32
    %c0_i32_0 = arith.constant 0 : i32
    %c0_i32_1 = arith.constant 0 : i32
    return %c0_i32, %c0_i32_0 : i32, i32
  }
  func.func @transform_9(%arg0: i32) -> (i32, i32) {
    %c0_i32 = arith.constant 0 : i32
    %c0_i32_0 = arith.constant 0 : i32
    return %arg0, %c0_i32 : i32, i32
  }
}

</mosaic_0001>

<bundles_post_ra>
// kernel: tpu_custom_call.1
= control target key start
LH: loop header
LB: loop body
LE: loop exit
PB: predicated region body
PF: predicated region fallthrough
CT: control target
= control target key end

     0   :  { %vm44_vm0 = vcmask 1043456   ;;  %vm40_vm1 = vcmask 31744   ;;  %s339_s0 = inlined_call_operand.vmem [shape: f32[8,32], index: 0, kind: input, shape index: {}]   ;;  %s340_s1 = inlined_call_operand.vmem [shape: f32[8,4], index: 1, kind: input, shape index: {}]   ;;  %s341_s2 = inlined_call_operand.vmem [shape: f32[32,64], index: 2, kind: input, shape index: {}]   ;;  %s342_s3 = inlined_call_operand.vmem [shape: f32[4,64], index: 3, kind: input, shape index: {}]   ;;  %s343_s4 = inlined_call_operand.vmem [shape: f32[1,64], index: 4, kind: input, shape index: {}]   ;;  %s344_s5 = inlined_call_operand.vmem [shape: f32[1,64], index: 5, kind: input, shape index: {}]   ;;  %s345_s6 = inlined_call_operand.vmem [shape: f32[1,64], index: 6, kind: input, shape index: {}]   ;;  %s346_s7 = inlined_call_operand.vmem [shape: f32[64,32], index: 7, kind: input, shape index: {}]   ;;  %s347_s8 = inlined_call_operand.vmem [shape: f32[1,32], index: 8, kind: input, shape index: {}]   ;;  %s348_s9 = inlined_call_operand.hbm [shape: f32[8,32], index: 9, kind: output, shape index: {}]  }
   0x1   :  { %v37_v0 = vld [vmem:[%s341_s2 + $0x18] sm:$0xff]  ;;  %v36_v1 = vld [vmem:[%s341_s2 + $0x10] sm:$0xff]  ;;  %v39_v2 = vld [vmem:[%s342_s3] sm:$0xf] }
   0x2   :  { %84 = vmatpush.msra.mxu1 %v37_v0  ;;  %v38_v3 = vld [vmem:[%s340_s1] sm:$0xff]  ;;  %v35_v4 = vld [vmem:[%s341_s2 + $0x8] sm:$0xff]  ;;  %186 = vmatpush.msk.msra.mxu0 %vm44_vm0, %v39_v2 }
   0x3   :  { %187 = vmatmul.msk.f32.vlgmr.msra.gmra.mxu0 %vm40_vm1, %v38_v3 }
   0x4   :  { %85 = vmatpush.msra.mxu1 %v36_v1 }
   0x5   :  { %14 = vsyncpa [#allocation3], 0  ;;  %v34_v5 = vld [vmem:[%s341_s2] sm:$0xff]  ;;  %vm68_vm2 = vcmask 261120   ;;  %vm97_vm3 = vcmask 523264   ;;  %v141_v15 = vld [vmem:[%s346_s7 + $0x38] sm:$0xff] }
   0x6   :  { %86 = vmatpush.msra.mxu1 %v35_v4  ;;  %v33_v6 = vld [vmem:[%s339_s0] sm:$0xff]  ;;  %157 = vmatpush.msra.mxu2 %v141_v15  ;;  %v140_v16 = vld [vmem:[%s346_s7 + $0x30] sm:$0xff]  ;;  %v139_v17 = vld [vmem:[%s346_s7 + $0x28] sm:$0xff]  ;;  %s223_s20 = smov [#allocation2]  }
   0x7   :  { %v191_v8 = vld [vmem:[%s343_s4] ss:$0 sm:$0xff]  ;;  %v137_v20 = vld [vmem:[%s346_s7 + $0x18] sm:$0xff]  ;;  %v136_v21 = vld [vmem:[%s346_s7 + $0x10] sm:$0xff]  ;;  %s175_s21 = sshll.u32 %s223_s20, 4  ;;  %s176_s21 = int_to_ptr.vmem [resolvable:$true] %s175_s21 }
   0x8   :  { %87 = vmatpush.msra.mxu1 %v34_v5  ;;  %158 = vmatpush.msra.mxu2 %v140_v16  ;;  %v138_v19 = vld [vmem:[%s346_s7 + $0x20] sm:$0xff]  ;;  %v135_v23 = vld [vmem:[%s346_s7 + $0x8] sm:$0xff] }
   0x9   :  { %188 = vmatmul.msk.f32.vlgmr.msra.gmra.mxu1 %vm68_vm2, %v33_v6  ;;  %v134_v24 = vld [vmem:[%s346_s7] sm:$0xff] }
   0xa   :  { %159 = vmatpush.msra.mxu2 %v139_v17  ;;  %v192_v38 = vld [vmem:[%s344_s5] ss:$0 sm:$0xff]  ;;  %s177_s5 = sshll.u32 %s348_s9, 4  ;;  %s178_s5 = int_to_ptr.hbm [resolvable:$true] %s177_s5 }
   0xb   :  { %v193_v41 = vld [vmem:[%s345_s6] ss:$0 sm:$0xff] }
   0xc   :  { %160 = vmatpush.msra.mxu2 %v138_v19  ;;  %v194_v45 = vld [vmem:[%s347_s8] ss:$0 sm:$0xff] }
   0xe   :  { %161 = vmatpush.msra.mxu2 %v137_v20 }
  0x10   :  { %162 = vmatpush.msra.mxu2 %v136_v21 }
  0x12   :  { %163 = vmatpush.msra.mxu2 %v135_v23 }
  0x14   :  { %164 = vmatpush.msra.mxu2 %v134_v24 }
  0x80   :  { %v65_v7 = vpop.f32.mrf.mxu0 }
  0x86   :  { %v89_v9 = vpop.f32.mrf.mxu1 }
  0x87   :  { %v90_v10 = vadd.f32 %v89_v9, %v65_v7 }
  0x89   :  { %v96_v11 = vadd.f32 %v191_v8, %v90_v10 }
  0x8b   :  { %v98_v12 = vsel %vm97_vm3, %v96_v11, 0.0  ;;  %v101_v13 = vmul.f32 %v96_v11, %v96_v11 }
  0x8c   :  { %99 = vadd.xlane.f32.xlu0 %v98_v12 }
  0x8d   :  { %v102_v14 = vsel %vm97_vm3, %v101_v13, 0.0 }
  0x94   :  { %103 = vadd.xlane.f32.xlu0 %v102_v14 }
  0xff   :  { %v100_v18 = vpop.xlane.xlu0 %99 }
 0x100   :  { %v105_v22 = vmul.f32 0.015625, %v100_v18 }
 0x102   :  { %v107_v26 = vmul.f32 %v105_v22, %v105_v22  ;;  %v110_v37 = vsub.f32 %v96_v11, %v105_v22 }
 0x107   :  { %v104_v25 = vpop.xlane.xlu0 %103 }
 0x108   :  { %v106_v27 = vmul.f32 0.015625, %v104_v25 }
 0x10a   :  { %v108_v28 = vsub.f32 %v106_v27, %v107_v26 }
 0x10c   :  { %v109_v29 = vmax.f32 %v108_v28, 0.0 }
 0x10e   :  { %v111_v30 = vadd.f32 1e-05, %v109_v29 }
 0x110   :  { %195 = vrsqrt.f32 %v111_v30  ;;  %vm118_vm5 = vweird.f32 %v111_v30 }
 0x116   :  { %v196_v31 = vpop.eup %195 }
 0x117   :  { %v113_v32 = vmul.f32 %v196_v31, %v111_v30  ;;  %vm119_vm4 = vweird.f32 %v196_v31 }
 0x118   :  { %vm120_vm6 = vmor %vm118_vm5, %vm119_vm4 }
 0x119   :  { %v114_v33 = vmul.f32 %v196_v31, %v113_v32 }
 0x11b   :  { %v115_v34 = vmul.f32 0.5, %v114_v33 }
 0x11d   :  { %v116_v35 = vsub.f32 1.5, %v115_v34 }
 0x11f   :  { %v117_v36 = vmul.f32 %v196_v31, %v116_v35 }
 0x121   :  { %v121_v39 = vsel %vm120_vm6, %v196_v31, %v117_v36 }
 0x122   :  { %v122_v40 = vmul.f32 %v121_v39, %v110_v37 }
 0x124   :  { %v127_v42 = vmul.f32 %v192_v38, %v122_v40 }
 0x126   :  { %v132_v43 = vadd.f32 %v193_v41, %v127_v42 }
 0x128   :  { %v133_v44 = vmax.f32 %v132_v43, 0.0 }
 0x12a   :  { %189 = vmatmul.msk.f32.vlgmr.msra.gmra.mxu2 %vm97_vm3, %v133_v44 }
 0x1ad   :  { %v166_v46 = vpop.f32.mrf.mxu2 }
 0x1ae   :  { %v167_v47 = vadd.f32 %v194_v45, %v166_v46 }
 0x1b0   :  { %169 = vst.msk [vmem:[#allocation2] sm:$0xff] %vm68_vm2, %v167_v47 }
 0x1b1   :  { %180 = dma.vmem_to_hbm [thread:$0]  %s176_s21, 128, %s178_s5, [#allocation3]  }
 0x1b2   :  { %221 = dma.done.wait [#allocation3], 128  }
 0x1b3   :  { %222 = vsyncadd [#allocation3], 4294967168 }
 0x1b4   :  { %185 = vsyncpa [#allocation3], 1 }

</bundles_post_ra>
